<compile_context>
chip_gen: v7x
topology: tpu7x:2x2x1
jax: 0.10.0
libtpu: 0.0.40
codegen_flags: <defaults>
</compile_context>

<pallas_src>
import math
import functools

import jax
import jax.numpy as jnp
from jax import lax
from jax.experimental import pallas as pl
from jax.experimental.pallas import tpu as pltpu


_SQRT_2_OVER_PI = math.sqrt(2.0 / math.pi)
_GELU_C1 = _SQRT_2_OVER_PI             # folded linear coefficient of the tanh argument
_GELU_C2 = _SQRT_2_OVER_PI * 0.044715  # folded cubic coefficient of the tanh argument


def _round_up(n, m):
    return ((n + m - 1) // m) * m


def _gelu_new(x):
    # HF "gelu_new": 0.5*x*(1 + tanh(sqrt(2/pi)*(x + 0.044715*x^3)))
    # Restructured as 0.5*x*(1 + tanh(x*(C1 + C2*x^2))) with folded constants:
    # one fewer f32 multiply on the VPU (no f32 FMA on v6e); tanh runs on the EUP.
    x2 = x * x
    t = jnp.tanh(x * (_GELU_C1 + _GELU_C2 * x2))
    return 0.5 * x * (1.0 + t)


def _layernorm_no_affine(x, eps):
    mu = jnp.mean(x, axis=-1, keepdims=True)
    xc = x - mu
    var = jnp.mean(xc * xc, axis=-1, keepdims=True)
    return xc * lax.rsqrt(var + eps)


def ffn_kernel(x_ref, w1v_ref, w1g_ref, w2_ref, o_ref, *, eps):
    # x_ref: (tm, H); w1v_ref/w1g_ref: (H, I); w2_ref: (I, H); o_ref: (tm, H)

    # LayerNorm 1 — statistics always in f32 regardless of input dtype.
    x = x_ref[...].astype(jnp.float32)
    xn = _layernorm_no_affine(x, eps)
    xn_mm = xn.astype(w1v_ref.dtype)  # MXU operands in the weight dtype (bf16-friendly)

    # GeGLU as two half-width MXU dots (value half / gate half of W1), f32 accumulation.
    a = jnp.dot(xn_mm, w1v_ref[...], preferred_element_type=jnp.float32)
    g = jnp.dot(xn_mm, w1g_ref[...], preferred_element_type=jnp.float32)
    u = a * _gelu_new(g)

    # LayerNorm 2 (no affine), f32 statistics.
    un = _layernorm_no_affine(u, eps)

    # Linear 2: (tm, I) @ (I, H) -> (tm, H), f32 accumulation on the MXU.
    y = jnp.dot(un.astype(w2_ref.dtype), w2_ref[...],
                preferred_element_type=jnp.float32)

    # Dropout -> identity (eval mode).
    o_ref[...] = y.astype(o_ref.dtype)


def feed_forward(x, w1_t, w2_t, *, eps=1e-7, tm=None, mxu_dtype=jnp.bfloat16):
    """x: [B, S, H]; w1_t: [H, 2I] (PyTorch weight pre-transposed); w2_t: [I, H].

    Returns [B, S, H]. Works for any B*S (token axis is padded to the tile size).
    NOTE: pass the module's actual layer_norm_eps (PyTorch nn.LayerNorm default is
    1e-5; LTG-BERT uses 1e-7).
    """
    B, S, H = x.shape
    two_I = w1_t.shape[1]
    I = two_I // 2
    M = B * S

    # Per-generation hardware limits (VMEM capacity drives the cap and the tile).
    try:
        vmem_cap = int(pltpu.get_tpu_info().vmem_capacity_bytes)
    except Exception:
        vmem_cap = 128 * 1024 * 1024
    vmem_hard_cap = int(0.85 * vmem_cap)  # headroom for compiler scratch / semaphores

    if tm is None:
        # 128-MiB parts (v5e/v6e): bigger token tile; 64-MiB v7x: keep 256.
        tm = 512 if vmem_cap >= 100 * 1024 * 1024 else 256

    # Cast f32 weights to the MXU dtype (bf16 by default): full-rate MXU and half the
    # resident-weight VMEM; accumulation stays f32 inside the kernel.
    if mxu_dtype is not None:
        w1_t = w1_t.astype(mxu_dtype)
        w2_t = w2_t.astype(mxu_dtype)

    # Split W1 into value/gate halves in the wrapper (free static slice) so the
    # kernel runs two aligned half-width dots.
    w1v_t = w1_t[:, :I]
    w1g_t = w1_t[:, I:]

    # Token tile: multiple of 8 sublanes; guarantee >= 2 grid steps when M allows so
    # the "parallel" axis can shard across v7x's two TensorCores.
    M8 = _round_up(max(M, 1), 8)
    tm_eff = max(8, min(_round_up(tm, 8), M8))
    if M8 >= 16 and pl.cdiv(M8, tm_eff) < 2:
        tm_eff = max(8, _round_up(pl.cdiv(M8, 2), 8))
    Mp = _round_up(M8, tm_eff)

    x2d = x.reshape(M, H)
    if Mp != M:
        # Zero rows are numerically safe only because eps > 0 (xc == 0, so
        # rsqrt(var + eps) is finite and the padded rows stay zero); they are
        # sliced off after the call.
        x2d = jnp.pad(x2d, ((0, Mp - M), (0, 0)))

    wbytes = (w1v_t.size * w1v_t.dtype.itemsize
              + w1g_t.size * w1g_t.dtype.itemsize
              + w2_t.size * w2_t.dtype.itemsize)
    abytes = 2 * 2 * tm_eff * H * x2d.dtype.itemsize   # in/out tiles, double-buffered
    sbytes = 4 * tm_eff * (H + 2 * I) * 4               # f32 intermediates (with margin)

    cost = pl.CostEstimate(
        flops=6 * M * H * I,            # (M,H)x(H,2I) + (M,I)x(I,H)
        transcendentals=M * I,          # tanh in gelu_new
        bytes_accessed=int(2 * Mp * H * x2d.dtype.itemsize + wbytes),
    )

    kernel = functools.partial(ffn_kernel, eps=eps)

    def run(single_buffer_weights):
        wfactor = 1 if single_buffer_weights else 2
        vmem_limit = int(min(max(wfactor * wbytes + abytes + sbytes,
                                 32 * 1024 * 1024),
                             vmem_hard_cap))
        wkw = ({"pipeline_mode": pl.Buffered(1)} if single_buffer_weights else {})
        return pl.pallas_call(
            kernel,
            out_shape=jax.ShapeDtypeStruct((Mp, H), x.dtype),
            grid_spec=pltpu.PrefetchScalarGridSpec(
                num_scalar_prefetch=0,
                grid=(Mp // tm_eff,),
                in_specs=[
                    pl.BlockSpec((tm_eff, H), lambda i: (i, 0)),        # token tile
                    pl.BlockSpec((H, I), lambda i: (0, 0), **wkw),      # W1 value half
                    pl.BlockSpec((H, I), lambda i: (0, 0), **wkw),      # W1 gate half
                    pl.BlockSpec((I, H), lambda i: (0, 0), **wkw),      # W2^T
                ],
                out_specs=pl.BlockSpec((tm_eff, H), lambda i: (i, 0)),
            ),
            compiler_params=pltpu.CompilerParams(
                dimension_semantics=("parallel",),
                vmem_limit_bytes=vmem_limit,
            ),
            cost_estimate=cost,
        )(x2d, w1v_t, w1g_t, w2_t)

    try:
        # Single-buffer the constant-index weight blocks (never re-fetched).
        out2d = run(True)
    except Exception:
        # Fallback: default double-buffered weight specs.
        out2d = run(False)

    if Mp != M:
        out2d = out2d[:M]
    return out2d.reshape(B, S, H)


def feed_forward_ref(x, w1_t, w2_t, *, eps=1e-7):
    """Pure-JAX reference matching the PyTorch module (eval mode), in f32."""
    x = x.astype(jnp.float32)
    I = w2_t.shape[0]
    xn = _layernorm_no_affine(x, eps)
    h = xn @ w1_t.astype(jnp.float32)
    a, g = h[..., :I], h[..., I:]
    u = a * _gelu_new(g)
    un = _layernorm_no_affine(u, eps)
    return un @ w2_t.astype(jnp.float32)


if __name__ == "__main__":
    # Small config: hidden=32, intermediate=64, batch=2, seq=8
    B, S, H, I = 2, 8, 32, 64
    eps = 1e-7

    key = jax.random.PRNGKey(0)
    kx, k1, k2 = jax.random.split(key, 3)

    x = jax.random.normal(kx, (B, S, H), dtype=jnp.float32)
    # PyTorch Linear weights are [out, in]; we store them pre-transposed [in, out].
    w1_t = jax.random.normal(k1, (H, 2 * I), dtype=jnp.float32) * (1.0 / math.sqrt(H))
    w2_t = jax.random.normal(k2, (I, H), dtype=jnp.float32) * (1.0 / math.sqrt(I))

    ref = feed_forward_ref(x, w1_t, w2_t, eps=eps)

    # Exact f32 MXU path (tight tolerance).
    out_f32 = feed_forward(x, w1_t, w2_t, eps=eps, mxu_dtype=jnp.float32)
    out_f32 = jax.block_until_ready(out_f32)
    assert out_f32.shape == (B, S, H)
    assert jnp.allclose(out_f32, ref, atol=1e-4, rtol=1e-4), "f32 mismatch vs reference"

    # Default path: f32 activations, weights cast to bf16 for the MXU.
    out_def = feed_forward(x, w1_t, w2_t, eps=eps)
    out_def = jax.block_until_ready(out_def)
    assert out_def.shape == (B, S, H)
    assert jnp.allclose(out_def, ref, atol=1e-1, rtol=1e-1), \
        "bf16-weight mismatch vs reference"

    # Fully bf16 activations + weights (f32 LN stats + f32 MXU accumulation inside).
    out_bf16 = feed_forward(x.astype(jnp.bfloat16),
                            w1_t.astype(jnp.bfloat16),
                            w2_t.astype(jnp.bfloat16), eps=eps)
    out_bf16 = jax.block_until_ready(out_bf16)
    assert jnp.allclose(out_bf16.astype(jnp.float32), ref, atol=1e-1, rtol=1e-1), \
        "bf16 mismatch vs reference"

    print("KERNEL_OK")
</pallas_src>

<mosaic_0001>
module attributes {stable_mosaic.version = 11 : i64} {
  func.func @ffn_kernel(%arg0: i32, %arg1: memref<8x32xf32, #tpu.memory_space<vmem>>, %arg2: memref<32x64xf32, #tpu.memory_space<vmem>>, %arg3: memref<32x64xf32, #tpu.memory_space<vmem>>, %arg4: memref<64x32xf32, #tpu.memory_space<vmem>>, %arg5: memref<8x32xf32, #tpu.memory_space<vmem>>) attributes {dimension_semantics = [#tpu.dimension_semantics<parallel>], iteration_bounds = array<i64: 2>, scalar_prefetch = 0 : i64, scratch_operands = 0 : i64, tpu.core_type = #tpu.core_type<tc>, window_params = [{transform_indices = @transform_0, window_bounds = array<i64: 8, 32>}, {pipeline_mode = #tpu.pipeline_mode<synchronous>, transform_indices = @transform_1, window_bounds = array<i64: 32, 64>}, {pipeline_mode = #tpu.pipeline_mode<synchronous>, transform_indices = @transform_2, window_bounds = array<i64: 32, 64>}, {pipeline_mode = #tpu.pipeline_mode<synchronous>, transform_indices = @transform_3, window_bounds = array<i64: 64, 32>}, {transform_indices = @transform_4, window_bounds = array<i64: 8, 32>}]} {
    %c0 = arith.constant 0 : index
    %c0_0 = arith.constant 0 : index
    %0 = vector.load %arg1[%c0, %c0_0] : memref<8x32xf32, #tpu.memory_space<vmem>>, vector<8x32xf32>
    %cst = arith.constant dense<0.000000e+00> : vector<8xf32>
    %1 = vector.multi_reduction <add>, %0, %cst [1] : vector<8x32xf32> to vector<8xf32>
    %2 = vector.shape_cast %1 : vector<8xf32> to vector<8x1xf32>
    %cst_1 = arith.constant 3.200000e+01 : f32
    %3 = vector.broadcast %cst_1 : f32 to vector<8x1xf32>
    %4 = arith.divf %2, %3 : vector<8x1xf32>
    %5 = vector.broadcast %4 : vector<8x1xf32> to vector<8x32xf32>
    %6 = arith.subf %0, %5 : vector<8x32xf32>
    %7 = arith.mulf %6, %6 : vector<8x32xf32>
    %cst_2 = arith.constant dense<0.000000e+00> : vector<8xf32>
    %8 = vector.multi_reduction <add>, %7, %cst_2 [1] : vector<8x32xf32> to vector<8xf32>
    %9 = vector.shape_cast %8 : vector<8xf32> to vector<8x1xf32>
    %cst_3 = arith.constant 3.200000e+01 : f32
    %10 = vector.broadcast %cst_3 : f32 to vector<8x1xf32>
    %11 = arith.divf %9, %10 : vector<8x1xf32>
    %cst_4 = arith.constant 1.000000e-07 : f32
    %12 = vector.broadcast %cst_4 : f32 to vector<8x1xf32>
    %13 = arith.addf %11, %12 : vector<8x1xf32>
    %14 = math.rsqrt %13 : vector<8x1xf32>
    %15 = vector.broadcast %14 : vector<8x1xf32> to vector<8x32xf32>
    %16 = arith.mulf %6, %15 : vector<8x32xf32>
    %c0_5 = arith.constant 0 : index
    %c0_6 = arith.constant 0 : index
    %17 = vector.load %arg2[%c0_5, %c0_6] : memref<32x64xf32, #tpu.memory_space<vmem>>, vector<32x64xf32>
    %cst_7 = arith.constant dense<0.000000e+00> : vector<8x64xf32>
    %18 = tpu.matmul %16, %17, %cst_7 {dimension_numbers = #tpu.dot_dimension_numbers<[1], [0], [0], [1], [0, 0, 1, 1], [], []>} : vector<8x32xf32>, vector<32x64xf32>, vector<8x64xf32> -> vector<8x64xf32>
    %c0_8 = arith.constant 0 : index
    %c0_9 = arith.constant 0 : index
    %19 = vector.load %arg3[%c0_8, %c0_9] : memref<32x64xf32, #tpu.memory_space<vmem>>, vector<32x64xf32>
    %cst_10 = arith.constant dense<0.000000e+00> : vector<8x64xf32>
    %20 = tpu.matmul %16, %19, %cst_10 {dimension_numbers = #tpu.dot_dimension_numbers<[1], [0], [0], [1], [0, 0, 1, 1], [], []>} : vector<8x32xf32>, vector<32x64xf32>, vector<8x64xf32> -> vector<8x64xf32>
    %21 = arith.mulf %20, %20 : vector<8x64xf32>
    %cst_11 = arith.constant 0.0356774069 : f32
    %22 = vector.broadcast %cst_11 : f32 to vector<8x64xf32>
    %23 = arith.mulf %22, %21 : vector<8x64xf32>
    %cst_12 = arith.constant 0.797884583 : f32
    %24 = vector.broadcast %cst_12 : f32 to vector<8x64xf32>
    %25 = arith.addf %24, %23 : vector<8x64xf32>
    %26 = arith.mulf %20, %25 : vector<8x64xf32>
    %27 = math.tanh %26 : vector<8x64xf32>
    %cst_13 = arith.constant 5.000000e-01 : f32
    %28 = vector.broadcast %cst_13 : f32 to vector<8x64xf32>
    %29 = arith.mulf %28, %20 : vector<8x64xf32>
    %cst_14 = arith.constant 1.000000e+00 : f32
    %30 = vector.broadcast %cst_14 : f32 to vector<8x64xf32>
    %31 = arith.addf %30, %27 : vector<8x64xf32>
    %32 = arith.mulf %29, %31 : vector<8x64xf32>
    %33 = arith.mulf %18, %32 : vector<8x64xf32>
    %cst_15 = arith.constant dense<0.000000e+00> : vector<8xf32>
    %34 = vector.multi_reduction <add>, %33, %cst_15 [1] : vector<8x64xf32> to vector<8xf32>
    %35 = vector.shape_cast %34 : vector<8xf32> to vector<8x1xf32>
    %cst_16 = arith.constant 6.400000e+01 : f32
    %36 = vector.broadcast %cst_16 : f32 to vector<8x1xf32>
    %37 = arith.divf %35, %36 : vector<8x1xf32>
    %38 = vector.broadcast %37 : vector<8x1xf32> to vector<8x64xf32>
    %39 = arith.subf %33, %38 : vector<8x64xf32>
    %40 = arith.mulf %39, %39 : vector<8x64xf32>
    %cst_17 = arith.constant dense<0.000000e+00> : vector<8xf32>
    %41 = vector.multi_reduction <add>, %40, %cst_17 [1] : vector<8x64xf32> to vector<8xf32>
    %42 = vector.shape_cast %41 : vector<8xf32> to vector<8x1xf32>
    %cst_18 = arith.constant 6.400000e+01 : f32
    %43 = vector.broadcast %cst_18 : f32 to vector<8x1xf32>
    %44 = arith.divf %42, %43 : vector<8x1xf32>
    %cst_19 = arith.constant 1.000000e-07 : f32
    %45 = vector.broadcast %cst_19 : f32 to vector<8x1xf32>
    %46 = arith.addf %44, %45 : vector<8x1xf32>
    %47 = math.rsqrt %46 : vector<8x1xf32>
    %48 = vector.broadcast %47 : vector<8x1xf32> to vector<8x64xf32>
    %49 = arith.mulf %39, %48 : vector<8x64xf32>
    %c0_20 = arith.constant 0 : index
    %c0_21 = arith.constant 0 : index
    %50 = vector.load %arg4[%c0_20, %c0_21] : memref<64x32xf32, #tpu.memory_space<vmem>>, vector<64x32xf32>
    %cst_22 = arith.constant dense<0.000000e+00> : vector<8x32xf32>
    %51 = tpu.matmul %49, %50, %cst_22 {dimension_numbers = #tpu.dot_dimension_numbers<[1], [0], [0], [1], [0, 0, 1, 1], [], []>} : vector<8x64xf32>, vector<64x32xf32>, vector<8x32xf32> -> vector<8x32xf32>
    %c0_23 = arith.constant 0 : index
    %c0_24 = arith.constant 0 : index
    %52 = vector.load %arg5[%c0_23, %c0_24] : memref<8x32xf32, #tpu.memory_space<vmem>>, vector<8x32xf32>
    tpu.vector_store %arg5[%c0_23, %c0_24], %51 {strides = array<i32>} : memref<8x32xf32, #tpu.memory_space<vmem>>, vector<8x32xf32>,
    return
  }
  func.func @transform_0(%arg0: i32) -> (i32, i32) {
    %c0_i32 = arith.constant 0 : i32
    %c0_i32_0 = arith.constant 0 : i32
    return %arg0, %c0_i32 : i32, i32
  }
  func.func @transform_1(%arg0: i32) -> (i32, i32) {
    %c0_i32 = arith.constant 0 : i32
    %c0_i32_0 = arith.constant 0 : i32
    %c0_i32_1 = arith.constant 0 : i32
    return %c0_i32, %c0_i32_0 : i32, i32
  }
  func.func @transform_2(%arg0: i32) -> (i32, i32) {
    %c0_i32 = arith.constant 0 : i32
    %c0_i32_0 = arith.constant 0 : i32
    %c0_i32_1 = arith.constant 0 : i32
    return %c0_i32, %c0_i32_0 : i32, i32
  }
  func.func @transform_3(%arg0: i32) -> (i32, i32) {
    %c0_i32 = arith.constant 0 : i32
    %c0_i32_0 = arith.constant 0 : i32
    %c0_i32_1 = arith.constant 0 : i32
    return %c0_i32, %c0_i32_0 : i32, i32
  }
  func.func @transform_4(%arg0: i32) -> (i32, i32) {
    %c0_i32 = arith.constant 0 : i32
    %c0_i32_0 = arith.constant 0 : i32
    return %arg0, %c0_i32 : i32, i32
  }
}

module attributes {stable_mosaic.version = 11 : i64} {
  func.func @ffn_kernel(%arg0: i32, %arg1: memref<8x32xf32, #tpu.memory_space<vmem>>, %arg2: memref<32x64xf32, #tpu.memory_space<vmem>>, %arg3: memref<32x64xf32, #tpu.memory_space<vmem>>, %arg4: memref<64x32xf32, #tpu.memory_space<vmem>>, %arg5: memref<8x32xf32, #tpu.memory_space<vmem>>) attributes {dimension_semantics = [#tpu.dimension_semantics<parallel>], iteration_bounds = array<i64: 2>, scalar_prefetch = 0 : i64, scratch_operands = 0 : i64, tpu.core_type = #tpu.core_type<tc>, window_params = [{transform_indices = @transform_0, window_bounds = array<i64: 8, 32>}, {pipeline_mode = #tpu.pipeline_mode<synchronous>, transform_indices = @transform_1, window_bounds = array<i64: 32, 64>}, {pipeline_mode = #tpu.pipeline_mode<synchronous>, transform_indices = @transform_2, window_bounds = array<i64: 32, 64>}, {pipeline_mode = #tpu.pipeline_mode<synchronous>, transform_indices = @transform_3, window_bounds = array<i64: 64, 32>}, {transform_indices = @transform_4, window_bounds = array<i64: 8, 32>}]} {
    %c0 = arith.constant 0 : index
    %c0_0 = arith.constant 0 : index
    %0 = vector.load %arg1[%c0, %c0_0] : memref<8x32xf32, #tpu.memory_space<vmem>>, vector<8x32xf32>
    %cst = arith.constant dense<0.000000e+00> : vector<8xf32>
    %1 = vector.multi_reduction <add>, %0, %cst [1] : vector<8x32xf32> to vector<8xf32>
    %2 = vector.shape_cast %1 : vector<8xf32> to vector<8x1xf32>
    %cst_1 = arith.constant 3.200000e+01 : f32
    %3 = vector.broadcast %cst_1 : f32 to vector<8x1xf32>
    %4 = arith.divf %2, %3 : vector<8x1xf32>
    %5 = vector.broadcast %4 : vector<8x1xf32> to vector<8x32xf32>
    %6 = arith.subf %0, %5 : vector<8x32xf32>
    %7 = arith.mulf %6, %6 : vector<8x32xf32>
    %cst_2 = arith.constant dense<0.000000e+00> : vector<8xf32>
    %8 = vector.multi_reduction <add>, %7, %cst_2 [1] : vector<8x32xf32> to vector<8xf32>
    %9 = vector.shape_cast %8 : vector<8xf32> to vector<8x1xf32>
    %cst_3 = arith.constant 3.200000e+01 : f32
    %10 = vector.broadcast %cst_3 : f32 to vector<8x1xf32>
    %11 = arith.divf %9, %10 : vector<8x1xf32>
    %cst_4 = arith.constant 1.000000e-07 : f32
    %12 = vector.broadcast %cst_4 : f32 to vector<8x1xf32>
    %13 = arith.addf %11, %12 : vector<8x1xf32>
    %14 = math.rsqrt %13 : vector<8x1xf32>
    %15 = vector.broadcast %14 : vector<8x1xf32> to vector<8x32xf32>
    %16 = arith.mulf %6, %15 : vector<8x32xf32>
    %c0_5 = arith.constant 0 : index
    %c0_6 = arith.constant 0 : index
    %17 = vector.load %arg2[%c0_5, %c0_6] : memref<32x64xf32, #tpu.memory_space<vmem>>, vector<32x64xf32>
    %cst_7 = arith.constant dense<0.000000e+00> : vector<8x64xf32>
    %18 = tpu.matmul %16, %17, %cst_7 {dimension_numbers = #tpu.dot_dimension_numbers<[1], [0], [0], [1], [0, 0, 1, 1], [], []>} : vector<8x32xf32>, vector<32x64xf32>, vector<8x64xf32> -> vector<8x64xf32>
    %c0_8 = arith.constant 0 : index
    %c0_9 = arith.constant 0 : index
    %19 = vector.load %arg3[%c0_8, %c0_9] : memref<32x64xf32, #tpu.memory_space<vmem>>, vector<32x64xf32>
    %cst_10 = arith.constant dense<0.000000e+00> : vector<8x64xf32>
    %20 = tpu.matmul %16, %19, %cst_10 {dimension_numbers = #tpu.dot_dimension_numbers<[1], [0], [0], [1], [0, 0, 1, 1], [], []>} : vector<8x32xf32>, vector<32x64xf32>, vector<8x64xf32> -> vector<8x64xf32>
    %21 = arith.mulf %20, %20 : vector<8x64xf32>
    %cst_11 = arith.constant 0.0356774069 : f32
    %22 = vector.broadcast %cst_11 : f32 to vector<8x64xf32>
    %23 = arith.mulf %22, %21 : vector<8x64xf32>
    %cst_12 = arith.constant 0.797884583 : f32
    %24 = vector.broadcast %cst_12 : f32 to vector<8x64xf32>
    %25 = arith.addf %24, %23 : vector<8x64xf32>
    %26 = arith.mulf %20, %25 : vector<8x64xf32>
    %27 = math.tanh %26 : vector<8x64xf32>
    %cst_13 = arith.constant 5.000000e-01 : f32
    %28 = vector.broadcast %cst_13 : f32 to vector<8x64xf32>
    %29 = arith.mulf %28, %20 : vector<8x64xf32>
    %cst_14 = arith.constant 1.000000e+00 : f32
    %30 = vector.broadcast %cst_14 : f32 to vector<8x64xf32>
    %31 = arith.addf %30, %27 : vector<8x64xf32>
    %32 = arith.mulf %29, %31 : vector<8x64xf32>
    %33 = arith.mulf %18, %32 : vector<8x64xf32>
    %cst_15 = arith.constant dense<0.000000e+00> : vector<8xf32>
    %34 = vector.multi_reduction <add>, %33, %cst_15 [1] : vector<8x64xf32> to vector<8xf32>
    %35 = vector.shape_cast %34 : vector<8xf32> to vector<8x1xf32>
    %cst_16 = arith.constant 6.400000e+01 : f32
    %36 = vector.broadcast %cst_16 : f32 to vector<8x1xf32>
    %37 = arith.divf %35, %36 : vector<8x1xf32>
    %38 = vector.broadcast %37 : vector<8x1xf32> to vector<8x64xf32>
    %39 = arith.subf %33, %38 : vector<8x64xf32>
    %40 = arith.mulf %39, %39 : vector<8x64xf32>
    %cst_17 = arith.constant dense<0.000000e+00> : vector<8xf32>
    %41 = vector.multi_reduction <add>, %40, %cst_17 [1] : vector<8x64xf32> to vector<8xf32>
    %42 = vector.shape_cast %41 : vector<8xf32> to vector<8x1xf32>
    %cst_18 = arith.constant 6.400000e+01 : f32
    %43 = vector.broadcast %cst_18 : f32 to vector<8x1xf32>
    %44 = arith.divf %42, %43 : vector<8x1xf32>
    %cst_19 = arith.constant 1.000000e-07 : f32
    %45 = vector.broadcast %cst_19 : f32 to vector<8x1xf32>
    %46 = arith.addf %44, %45 : vector<8x1xf32>
    %47 = math.rsqrt %46 : vector<8x1xf32>
    %48 = vector.broadcast %47 : vector<8x1xf32> to vector<8x64xf32>
    %49 = arith.mulf %39, %48 : vector<8x64xf32>
    %c0_20 = arith.constant 0 : index
    %c0_21 = arith.constant 0 : index
    %50 = vector.load %arg4[%c0_20, %c0_21] : memref<64x32xf32, #tpu.memory_space<vmem>>, vector<64x32xf32>
    %cst_22 = arith.constant dense<0.000000e+00> : vector<8x32xf32>
    %51 = tpu.matmul %49, %50, %cst_22 {dimension_numbers = #tpu.dot_dimension_numbers<[1], [0], [0], [1], [0, 0, 1, 1], [], []>} : vector<8x64xf32>, vector<64x32xf32>, vector<8x32xf32> -> vector<8x32xf32>
    %c0_23 = arith.constant 0 : index
    %c0_24 = arith.constant 0 : index
    %52 = vector.load %arg5[%c0_23, %c0_24] : memref<8x32xf32, #tpu.memory_space<vmem>>, vector<8x32xf32>
    tpu.vector_store %arg5[%c0_23, %c0_24], %51 {strides = array<i32>} : memref<8x32xf32, #tpu.memory_space<vmem>>, vector<8x32xf32>,
    return
  }
  func.func @transform_0(%arg0: i32) -> (i32, i32) {
    %c0_i32 = arith.constant 0 : i32
    %c0_i32_0 = arith.constant 0 : i32
    return %arg0, %c0_i32 : i32, i32
  }
  func.func @transform_1(%arg0: i32) -> (i32, i32) {
    %c0_i32 = arith.constant 0 : i32
    %c0_i32_0 = arith.constant 0 : i32
    %c0_i32_1 = arith.constant 0 : i32
    return %c0_i32, %c0_i32_0 : i32, i32
  }
  func.func @transform_2(%arg0: i32) -> (i32, i32) {
    %c0_i32 = arith.constant 0 : i32
    %c0_i32_0 = arith.constant 0 : i32
    %c0_i32_1 = arith.constant 0 : i32
    return %c0_i32, %c0_i32_0 : i32, i32
  }
  func.func @transform_3(%arg0: i32) -> (i32, i32) {
    %c0_i32 = arith.constant 0 : i32
    %c0_i32_0 = arith.constant 0 : i32
    %c0_i32_1 = arith.constant 0 : i32
    return %c0_i32, %c0_i32_0 : i32, i32
  }
  func.func @transform_4(%arg0: i32) -> (i32, i32) {
    %c0_i32 = arith.constant 0 : i32
    %c0_i32_0 = arith.constant 0 : i32
    return %arg0, %c0_i32 : i32, i32
  }
}

</mosaic_0001>

<bundles_post_ra>
// kernel: tpu_custom_call.1
= control target key start
LH: loop header
LB: loop body
LE: loop exit
PB: predicated region body
PF: predicated region fallthrough
CT: control target
= control target key end

     0   :  { %9 = vsyncpa [#allocation3], 0  ;;  %s944_s0 = inlined_call_operand.vmem [shape: f32[16,32], index: 0, kind: input, shape index: {}]   ;;  %s945_s1 = inlined_call_operand.vmem [shape: f32[32,64], index: 1, kind: input, shape index: {}]   ;;  %s946_s2 = inlined_call_operand.vmem [shape: f32[32,64], index: 2, kind: input, shape index: {}]   ;;  %s947_s3 = inlined_call_operand.vmem [shape: f32[64,32], index: 3, kind: input, shape index: {}]   ;;  %s948_s4 = inlined_call_operand.hbm [shape: f32[16,32], index: 4, kind: output, shape index: {}]  }
   0x1   :  { %11 = vsyncpa [#allocation3 + $0x1], 0  ;;  %s777_s15 = smov 0   ;;  %s779_s16 = smov 0  }
   0x2   :  { %s781_s17 = smov 0   ;;  %s783_s18 = smov 0  }
   0x3 LB: > { %s798_s19 = sadd.s32 4294967295, %s746_s18   ;;  %s539_s20 = sadd.s32 4294967294, %s746_s18   ;;  %s746_s18 = sphi %s783_s18, %s954_s18   ;;  %s742_s17 = sphi %s781_s17, %s953_s17   ;;  %s738_s16 = sphi %s779_s16, %s952_s16   ;;  %s734_s15 = sphi %s777_s15, %s951_s15  }
   0x4   : > { %s802_s21 = sadd.s32 1, %s746_s18   ;;  %s113_s22 = sadd.s32 1, %s742_s17 }
   0x5   : > { %s110_s23 = ssub.s32 %s746_s18, %s802_s21  ;;  %p123_p0 = scmp.ne.s32.totalorder %s742_s17, %s738_s16 }
   0x6   : > { %p111_p1 = scmp.eq.s32.totalorder %s110_s23, 0  ;;  %p124_p2 = scmp.eq.s32.totalorder %s798_s19, 1 }
   0x7   : > { %p129_p3 = scmp.ne.s32.totalorder %s738_s16, %s734_s15  ;;  %p130_p4 = scmp.eq.s32.totalorder %s539_s20, 1 }
   0x8   : > { %s813_s24 = scalar_select %p111_p1, %s742_s17, %s113_s22  }
   0x9   : > { %p815_p5 = por %p124_p2, %p123_p0  ;;  %p819_p6 = por %p130_p4, %p129_p3 }
   0xa   : > { %p542_p7 = scmp.ge.s32.totalorder %s746_s18, 1  ;;  %p164_p8 = scmp.lt.s32.totalorder %s746_s18, 3 }
   0xc   : > { %p165_p9 = pnand %p542_p7, %p164_p8 }
   0xd   : > { %p189_p10 = scmp.lt.s32.totalorder (!%p165_p9), %s798_s19, 1  ;;  %vm194_vm0 = vcmask (!%p165_p9), 261120   ;;  %v209_v7 = vld [vmem:[%s945_s1] sm:$0xff] (!%p165_p9)  ;;  %v210_v8 = vld [vmem:[%s945_s1 + $0x8] sm:$0xff] (!%p165_p9)  ;;  %v211_v9 = vld [vmem:[%s945_s1 + $0x10] sm:$0xff] (!%p165_p9)  ;;  %v748_v10 = vmov (!%p165_p9), 0.0|0.0  }
   0xe   : > { %168 = sbr.rel (%p165_p9) target bundleno = 1115 (0x45b), region = 36  ;;  %612 = vmatprep.subr.bf16.mxu1 (!%p165_p9), %v748_v10  ;;  %v613_v11 = vpack.c.bf16 (!%p165_p9), %v210_v8, %v209_v7  ;;  %v212_v12 = vld [vmem:[%s945_s1 + $0x18] sm:$0xff] (!%p165_p9)  ;;  %vm749_vm1 = vmmov (!%p165_p9), 0   ;;  %v750_v13 = vmov (!%p165_p9), 0.0   ;;  %624 = vmatprep.subr.bf16.mxu0 (!%p165_p9), %v748_v10  ;;  %v286_v18 = vld [vmem:[%s946_s2] sm:$0xff] (!%p165_p9)  ;;  %v287_v19 = vld [vmem:[%s946_s2 + $0x8] sm:$0xff] (!%p165_p9) }
   0xf   : > { %579 = vmatprep.mubr.msk.f32.mxu1 (!%p165_p9), %vm749_vm1, %v750_v13  ;;  %609 = vmatprep.mubr.msk.f32.mxu0 (!%p165_p9), %vm749_vm1, %v750_v13  ;;  %v616_v14 = vpack.c.bf16 (!%p165_p9), %v212_v12, %v211_v9  ;;  %v619_v21 = vpack.c.bf16 (!%p165_p9), %v287_v19, %v286_v18  ;;  %v288_v23 = vld [vmem:[%s946_s2 + $0x10] sm:$0xff] (!%p165_p9)  ;;  %v289_v24 = vld [vmem:[%s946_s2 + $0x18] sm:$0xff] (!%p165_p9)  ;;  %vm369_vm2 = vcmask (!%p165_p9), 523264   ;;  %v384_v45 = vld [vmem:[%s947_s3] sm:$0xff] (!%p165_p9)  ;;  %s186_s30 = sand.u32 (!%p165_p9), 1, %s738_s16   ;;  %s549_s6 = sshll.u32 (!%p165_p9), %s798_s19, 7 }
  0x10   : > { %614 = vmatpush3.bf16.msra.mxu1 (!%p165_p9), %v613_v11  ;;  %v622_v25 = vpack.c.bf16 (!%p165_p9), %v289_v24, %v288_v23  ;;  %v385_v46 = vld [vmem:[%s947_s3 + $0x8] sm:$0xff] (!%p165_p9)  ;;  %v386_v48 = vld [vmem:[%s947_s3 + $0x10] sm:$0xff] (!%p165_p9)  ;;  %v387_v49 = vld [vmem:[%s947_s3 + $0x18] sm:$0xff] (!%p165_p9)  ;;  %s901_s11 = scalar_lea.hbm (!%p165_p9), %s948_s4, %s549_s6  ;;  %s467_s12 = scalar_lea.sflag (!%p165_p9), [#allocation3], %s186_s30 }
  0x11   : > { %615 = vmatprep.subr.bf16.mxu1 (!%p165_p9), %v748_v10  ;;  %v625_v47 = vpack.c.bf16 (!%p165_p9), %v385_v46, %v384_v45  ;;  %v628_v50 = vpack.c.bf16 (!%p165_p9), %v387_v49, %v386_v48  ;;  %v388_v51 = vld [vmem:[%s947_s3 + $0x20] sm:$0xff] (!%p165_p9)  ;;  %v389_v52 = vld [vmem:[%s947_s3 + $0x28] sm:$0xff] (!%p165_p9)  ;;  %v390_v54 = vld [vmem:[%s947_s3 + $0x30] sm:$0xff] (!%p165_p9) }
  0x12   : > { %v631_v53 = vpack.c.bf16 (!%p165_p9), %v389_v52, %v388_v51  ;;  %v391_v55 = vld [vmem:[%s947_s3 + $0x38] sm:$0xff] (!%p165_p9) }
  0x13   : > { %626 = vmatpush3.bf16.msra.mxu0 (!%p165_p9), %v625_v47  ;;  %v634_v56 = vpack.c.bf16 (!%p165_p9), %v391_v55, %v390_v54 }
  0x14   : > { %617 = vmatpush3.bf16.msra.mxu1 (!%p165_p9), %v616_v14  ;;  %627 = vmatprep.subr.bf16.mxu0 (!%p165_p9), %v748_v10 }
  0x15   : > { %s190_s27 = scalar_select %p189_p10, %s798_s19, 1  ;;  %618 = vmatprep.subr.bf16.mxu1 %v748_v10 }
  0x16   : > { %s751_s19 = smov [#allocation2]  }
  0x17   : > { %s544_s28 = sshll.u32 %s190_s27, 3  ;;  %629 = vmatpush3.bf16.msra.mxu0 %v628_v50  ;;  %s688_s14 = sshll.u32 %s751_s19, 4  ;;  %s689_s14 = int_to_ptr.vmem [resolvable:$false] %s688_s14 }
  0x18   : > { %s192_s5 = scalar_lea.vmem %s944_s0, %s544_s28  ;;  %630 = vmatprep.subr.bf16.mxu0 %v748_v10  ;;  %s690_s20 = scalar_lea.vmem %s689_s14, 256 }
  0x19   : > { %v193_v0 = vld [vmem:[%s192_s5] sm:$0xff]  ;;  %s543_s5 = sshll.u32 %s186_s30, 3 }
  0x1a   : > { %v195_v1 = vsel %vm194_vm0, %v193_v0, 0.0  ;;  %s188_s7 = scalar_lea.vmem [#allocation2], %s543_s5 }
  0x1b   : > { %196 = vadd.xlane.f32.xlu0 %v195_v1  ;;  %632 = vmatpush3.bf16.msra.mxu0 %v631_v53  ;;  %s480_s8 = sshll.u32 %s188_s7, 4  ;;  %s903_s8 = int_to_ptr.vmem [resolvable:$true] %s480_s8 }
  0x1c   : > { %633 = vmatprep.subr.bf16.mxu0 %v748_v10  ;;  %s684_s13 = scalar_lea.vmem %s903_s8, 128  ;;  %p691_p0 = scmp.lt.s32.totalorder %s903_s8, %s689_s14 }
  0x1d   : > { %p685_p11 = scmp.ne.s32.totalorder %s903_s8, %s684_s13  ;;  %p692_p1 = scmp.lt.s32.totalorder %s690_s20, %s684_s13 }
  0x1f   : > { %635 = vmatpush3.bf16.msra.mxu0 %v634_v56  ;;  %p686_p12 = pnand %p685_p11, %p815_p5  ;;  %p693_p2 = por %p692_p1, %p691_p0 }
  0x21   : > { %p687_p13 = pneg %p686_p12 }
  0x23   : > { %p694_p3 = pnand %p693_p2, %p687_p13 }
  0xa8   : > { %v197_v2 = vpop.xlane.xlu0 %196 }
  0xa9   : > { %v199_v3 = vmul.f32 0.03125, %v197_v2 }
  0xab   : > { %v200_v4 = vsub.f32 %v193_v0, %v199_v3 }
  0xad   : > { %v201_v5 = vmul.f32 %v200_v4, %v200_v4 }
  0xaf   : > { %v202_v6 = vsel %vm194_vm0, %v201_v5, 0.0 }
  0xb0   : > { %203 = vadd.xlane.f32.xlu0 %v202_v6 }
 0x13d   : > { %v204_v15 = vpop.xlane.xlu0 %203 }
 0x13e   : > { %v205_v16 = vmul.f32 0.03125, %v204_v15 }
 0x140   : > { %v206_v17 = vadd.f32 1e-07, %v205_v16 }
 0x142   : > { %678 = vrsqrt.f32 %v206_v17 }
 0x14c   : > { %v679_v20 = vpop.eup %678 }
 0x14d   : > { %v208_v22 = vmul.f32 %v679_v20, %v200_v4 }
 0x14f   : > { %580 = vmatmul.mubr.msk.f32.vlgmr.msra.gmra.mrb[0].mxu1 %vm194_vm0, %v208_v22 }
 0x150   : > { %620 = vmatpush3.bf16.msra.mxu1 %v619_v21  ;;  %590 = vmatprep.mubr.msk.f32.mxu1 %vm749_vm1, %v750_v13 }
 0x151   : > { %621 = vmatprep.subr.bf16.mxu1 %v748_v10 }
 0x154   : > { %623 = vmatpush3.bf16.msra.mxu1 %v622_v25 }
 0x157   : > { %591 = vmatmul.mubr.msk.f32.vlgmr.msra.gmra.mrb[2].mxu1 %vm194_vm0, %v208_v22 }
 0x222   : > { %v282_v26 = vpop.f32.mrb[0].mxu1 }
 0x223   : > { %v581_v27 = vpop.f32.mrb[1].mxu1 }
 0x22a   : > { %v356_v28 = vpop.f32.mrb[2].mxu1 }
 0x22b   : > { %v360_v29 = vmul.f32 %v356_v28, %v356_v28  ;;  %v592_v30 = vpop.f32.mrb[3].mxu1  ;;  %v365_v35 = vmul.f32 0.5, %v356_v28 }
 0x22d   : > { %v361_v31 = vmul.f32 0.035677407, %v360_v29 }
 0x22f   : > { %v362_v32 = vadd.f32 0.7978846, %v361_v31 }
 0x231   : > { %v363_v33 = vmul.f32 %v362_v32, %v356_v28 }
 0x233   : > { %680 = vtanh.f32 %v363_v33 }
 0x23d   : > { %v681_v34 = vpop.eup %680 }
 0x23e   : > { %v366_v36 = vadd.f32 1.0, %v681_v34 }
 0x240   : > { %v367_v37 = vmul.f32 %v366_v36, %v365_v35 }
 0x242   : > { %v368_v38 = vmul.f32 %v367_v37, %v282_v26 }
 0x244   : > { %v370_v39 = vsel %vm369_vm2, %v368_v38, 0.0 }
 0x245   : > { %371 = vadd.xlane.f32.xlu1 %v370_v39 }
 0x2d2   : > { %v372_v40 = vpop.xlane.xlu1 %371 }
 0x2d3   : > { %v374_v41 = vmul.f32 0.015625, %v372_v40 }
 0x2d5   : > { %v375_v42 = vsub.f32 %v368_v38, %v374_v41 }
 0x2d7   : > { %v376_v43 = vmul.f32 %v375_v42, %v375_v42 }
 0x2d9   : > { %v377_v44 = vsel %vm369_vm2, %v376_v43, 0.0 }
 0x2da   : > { %378 = vadd.xlane.f32.xlu1 %v377_v44 }
 0x367   : > { %v379_v57 = vpop.xlane.xlu1 %378 }
 0x368   : > { %v380_v58 = vmul.f32 0.015625, %v379_v57 }
 0x36a   : > { %v381_v59 = vadd.f32 1e-07, %v380_v58 }
 0x36c   : > { %682 = vrsqrt.f32 %v381_v59 }
 0x376   : > { %v683_v60 = vpop.eup %682 }
 0x377   : > { %v383_v61 = vmul.f32 %v683_v60, %v375_v42 }
 0x379   : > { %610 = vmatmul.mubr.msk.f32.vlgmr.msra.gmra.mrb[0].mxu0 %vm369_vm2, %v383_v61 }
 0x44c   : > { %v461_v62 = vpop.f32.mrb[0].mxu0 }
 0x44d   : > { %465 = vst.msk [vmem:[%s188_s7] sm:$0xff] %vm194_vm0, %v461_v62  ;;  %v611_v63 = vpop.f32.mrb[1].mxu0 }
 0x44e   : > { %697 = shalt.err (!%p694_p3)
}
 0x44f   : > { %s698_s22 = scalar_lea.hbm %s901_s11, 128  ;;  %s702_s28 = scalar_lea.hbm %s948_s4, 256 }
 0x450   : > { %p699_p4 = scmp.ne.s32.totalorder %s901_s11, %s698_s22  ;;  %p703_p9 = scmp.lt.u32.totalorder %s901_s11, %s948_s4 }
 0x451   : > { %p704_p10 = scmp.lt.u32.totalorder %s702_s28, %s698_s22  ;;  %p706_p12 = scmp.lt.u32.totalorder %s698_s22, %s901_s11 }
 0x452   : > { %p700_p7 = pnand %p699_p4, %p815_p5 }
 0x453   : > { %p705_p11 = por %p704_p10, %p703_p9 }
 0x454   : > { %p701_p8 = pneg %p700_p7 }
 0x455   : > { %p707_p13 = por %p706_p12, %p705_p11 }
 0x457   : > { %p708_p0 = pnand %p707_p13, %p701_p8 }
 0x459   : > { %711 = shalt.err (!%p708_p0)
}
 0x45a   : > { %636 = dma.vmem_to_hbm [thread:$0]  (%p815_p5), %s903_s8, 128, %s901_s11, %s467_s12  }
 0x45b PF: > { %p642_p1 = scmp.ge.s32.totalorder %s746_s18, 2  ;;  %s492_s5 = sand.u32 1, %s734_s15  }
 0x45c   : > { %s493_s6 = scalar_lea.sflag [#allocation3], %s492_s5 }
 0x45d   : > { %p639_p2 = pnand %p642_p1, %p819_p6 }
 0x45f   : > { %729 = dma.done.wait (!%p639_p2), %s493_s6, 128  }
 0x460   : > { %731 = vsyncadd (!%p639_p2), %s493_s6, 4294967168  ;;  %p14_p3 = scmp.ge.s32.totalorder %s802_s21, 4   ;;  %s951_s15 = smov %s738_s16 }
 0x461   : > { %s952_s16 = smov %s742_s17  ;;  %s953_s17 = smov %s813_s24 }
 0x462   : > { %s954_s18 = smov %s802_s21  ;;  %16 = sbr.rel (!%p14_p3) target bundleno = 3 (0x3), region = 71 }
 0x469   :  { %498 = vsyncpa [#allocation3], 1 }
 0x46a   :  { %500 = vsyncpa [#allocation3 + $0x1], 1 }

// kernel: tpu_custom_call.1
= control target key start
LH: loop header
LB: loop body
LE: loop exit
PB: predicated region body
PF: predicated region fallthrough
CT: control target
= control target key end

     0   :  { %9 = vsyncpa [#allocation3], 0  ;;  %s944_s0 = inlined_call_operand.vmem [shape: f32[16,32], index: 0, kind: input, shape index: {}]   ;;  %s945_s1 = inlined_call_operand.vmem [shape: f32[32,64], index: 1, kind: input, shape index: {}]   ;;  %s946_s2 = inlined_call_operand.vmem [shape: f32[32,64], index: 2, kind: input, shape index: {}]   ;;  %s947_s3 = inlined_call_operand.vmem [shape: f32[64,32], index: 3, kind: input, shape index: {}]   ;;  %s948_s4 = inlined_call_operand.hbm [shape: f32[16,32], index: 4, kind: output, shape index: {}]  }
   0x1   :  { %11 = vsyncpa [#allocation3 + $0x1], 0  ;;  %s777_s15 = smov 0   ;;  %s779_s16 = smov 0  }
   0x2   :  { %s781_s17 = smov 0   ;;  %s783_s18 = smov 0  }
   0x3 LB: > { %s798_s19 = sadd.s32 4294967295, %s746_s18   ;;  %s539_s20 = sadd.s32 4294967294, %s746_s18   ;;  %s746_s18 = sphi %s783_s18, %s954_s18   ;;  %s742_s17 = sphi %s781_s17, %s953_s17   ;;  %s738_s16 = sphi %s779_s16, %s952_s16   ;;  %s734_s15 = sphi %s777_s15, %s951_s15  }
   0x4   : > { %s802_s21 = sadd.s32 1, %s746_s18   ;;  %s113_s22 = sadd.s32 1, %s742_s17 }
   0x5   : > { %s110_s23 = ssub.s32 %s746_s18, %s802_s21  ;;  %p123_p0 = scmp.ne.s32.totalorder %s742_s17, %s738_s16 }
   0x6   : > { %p111_p1 = scmp.eq.s32.totalorder %s110_s23, 0  ;;  %p124_p2 = scmp.eq.s32.totalorder %s798_s19, 1 }
   0x7   : > { %p129_p3 = scmp.ne.s32.totalorder %s738_s16, %s734_s15  ;;  %p130_p4 = scmp.eq.s32.totalorder %s539_s20, 1 }
   0x8   : > { %s813_s24 = scalar_select %p111_p1, %s742_s17, %s113_s22  }
   0x9   : > { %p815_p5 = por %p124_p2, %p123_p0  ;;  %p819_p6 = por %p130_p4, %p129_p3 }
   0xa   : > { %p542_p7 = scmp.ge.s32.totalorder %s746_s18, 1  ;;  %p164_p8 = scmp.lt.s32.totalorder %s746_s18, 3 }
   0xc   : > { %p165_p9 = pnand %p542_p7, %p164_p8 }
   0xd   : > { %p189_p10 = scmp.lt.s32.totalorder (!%p165_p9), %s798_s19, 1  ;;  %vm194_vm0 = vcmask (!%p165_p9), 261120   ;;  %v209_v7 = vld [vmem:[%s945_s1] sm:$0xff] (!%p165_p9)  ;;  %v210_v8 = vld [vmem:[%s945_s1 + $0x8] sm:$0xff] (!%p165_p9)  ;;  %v211_v9 = vld [vmem:[%s945_s1 + $0x10] sm:$0xff] (!%p165_p9)  ;;  %v748_v10 = vmov (!%p165_p9), 0.0|0.0  }
   0xe   : > { %168 = sbr.rel (%p165_p9) target bundleno = 1115 (0x45b), region = 36  ;;  %612 = vmatprep.subr.bf16.mxu1 (!%p165_p9), %v748_v10  ;;  %v613_v11 = vpack.c.bf16 (!%p165_p9), %v210_v8, %v209_v7  ;;  %v212_v12 = vld [vmem:[%s945_s1 + $0x18] sm:$0xff] (!%p165_p9)  ;;  %vm749_vm1 = vmmov (!%p165_p9), 0   ;;  %v750_v13 = vmov (!%p165_p9), 0.0   ;;  %624 = vmatprep.subr.bf16.mxu0 (!%p165_p9), %v748_v10  ;;  %v286_v18 = vld [vmem:[%s946_s2] sm:$0xff] (!%p165_p9)  ;;  %v287_v19 = vld [vmem:[%s946_s2 + $0x8] sm:$0xff] (!%p165_p9) }
   0xf   : > { %579 = vmatprep.mubr.msk.f32.mxu1 (!%p165_p9), %vm749_vm1, %v750_v13  ;;  %609 = vmatprep.mubr.msk.f32.mxu0 (!%p165_p9), %vm749_vm1, %v750_v13  ;;  %v616_v14 = vpack.c.bf16 (!%p165_p9), %v212_v12, %v211_v9  ;;  %v619_v21 = vpack.c.bf16 (!%p165_p9), %v287_v19, %v286_v18  ;;  %v288_v23 = vld [vmem:[%s946_s2 + $0x10] sm:$0xff] (!%p165_p9)  ;;  %v289_v24 = vld [vmem:[%s946_s2 + $0x18] sm:$0xff] (!%p165_p9)  ;;  %vm369_vm2 = vcmask (!%p165_p9), 523264   ;;  %v384_v45 = vld [vmem:[%s947_s3] sm:$0xff] (!%p165_p9)  ;;  %s186_s30 = sand.u32 (!%p165_p9), 1, %s738_s16   ;;  %s549_s6 = sshll.u32 (!%p165_p9), %s798_s19, 7 }
  0x10   : > { %614 = vmatpush3.bf16.msra.mxu1 (!%p165_p9), %v613_v11  ;;  %v622_v25 = vpack.c.bf16 (!%p165_p9), %v289_v24, %v288_v23  ;;  %v385_v46 = vld [vmem:[%s947_s3 + $0x8] sm:$0xff] (!%p165_p9)  ;;  %v386_v48 = vld [vmem:[%s947_s3 + $0x10] sm:$0xff] (!%p165_p9)  ;;  %v387_v49 = vld [vmem:[%s947_s3 + $0x18] sm:$0xff] (!%p165_p9)  ;;  %s901_s11 = scalar_lea.hbm (!%p165_p9), %s948_s4, %s549_s6  ;;  %s467_s12 = scalar_lea.sflag (!%p165_p9), [#allocation3], %s186_s30 }
  0x11   : > { %615 = vmatprep.subr.bf16.mxu1 (!%p165_p9), %v748_v10  ;;  %v625_v47 = vpack.c.bf16 (!%p165_p9), %v385_v46, %v384_v45  ;;  %v628_v50 = vpack.c.bf16 (!%p165_p9), %v387_v49, %v386_v48  ;;  %v388_v51 = vld [vmem:[%s947_s3 + $0x20] sm:$0xff] (!%p165_p9)  ;;  %v389_v52 = vld [vmem:[%s947_s3 + $0x28] sm:$0xff] (!%p165_p9)  ;;  %v390_v54 = vld [vmem:[%s947_s3 + $0x30] sm:$0xff] (!%p165_p9) }
  0x12   : > { %v631_v53 = vpack.c.bf16 (!%p165_p9), %v389_v52, %v388_v51  ;;  %v391_v55 = vld [vmem:[%s947_s3 + $0x38] sm:$0xff] (!%p165_p9) }
  0x13   : > { %626 = vmatpush3.bf16.msra.mxu0 (!%p165_p9), %v625_v47  ;;  %v634_v56 = vpack.c.bf16 (!%p165_p9), %v391_v55, %v390_v54 }
  0x14   : > { %617 = vmatpush3.bf16.msra.mxu1 (!%p165_p9), %v616_v14  ;;  %627 = vmatprep.subr.bf16.mxu0 (!%p165_p9), %v748_v10 }
  0x15   : > { %s190_s27 = scalar_select %p189_p10, %s798_s19, 1  ;;  %618 = vmatprep.subr.bf16.mxu1 %v748_v10 }
  0x16   : > { %s751_s19 = smov [#allocation2]  }
  0x17   : > { %s544_s28 = sshll.u32 %s190_s27, 3  ;;  %629 = vmatpush3.bf16.msra.mxu0 %v628_v50  ;;  %s688_s14 = sshll.u32 %s751_s19, 4  ;;  %s689_s14 = int_to_ptr.vmem [resolvable:$false] %s688_s14 }
  0x18   : > { %s192_s5 = scalar_lea.vmem %s944_s0, %s544_s28  ;;  %630 = vmatprep.subr.bf16.mxu0 %v748_v10  ;;  %s690_s20 = scalar_lea.vmem %s689_s14, 256 }
  0x19   : > { %v193_v0 = vld [vmem:[%s192_s5] sm:$0xff]  ;;  %s543_s5 = sshll.u32 %s186_s30, 3 }
  0x1a   : > { %v195_v1 = vsel %vm194_vm0, %v193_v0, 0.0  ;;  %s188_s7 = scalar_lea.vmem [#allocation2], %s543_s5 }
  0x1b   : > { %196 = vadd.xlane.f32.xlu0 %v195_v1  ;;  %632 = vmatpush3.bf16.msra.mxu0 %v631_v53  ;;  %s480_s8 = sshll.u32 %s188_s7, 4  ;;  %s903_s8 = int_to_ptr.vmem [resolvable:$true] %s480_s8 }
  0x1c   : > { %633 = vmatprep.subr.bf16.mxu0 %v748_v10  ;;  %s684_s13 = scalar_lea.vmem %s903_s8, 128  ;;  %p691_p0 = scmp.lt.s32.totalorder %s903_s8, %s689_s14 }
  0x1d   : > { %p685_p11 = scmp.ne.s32.totalorder %s903_s8, %s684_s13  ;;  %p692_p1 = scmp.lt.s32.totalorder %s690_s20, %s684_s13 }
  0x1f   : > { %635 = vmatpush3.bf16.msra.mxu0 %v634_v56  ;;  %p686_p12 = pnand %p685_p11, %p815_p5  ;;  %p693_p2 = por %p692_p1, %p691_p0 }
  0x21   : > { %p687_p13 = pneg %p686_p12 }
  0x23   : > { %p694_p3 = pnand %p693_p2, %p687_p13 }
  0xa8   : > { %v197_v2 = vpop.xlane.xlu0 %196 }
  0xa9   : > { %v199_v3 = vmul.f32 0.03125, %v197_v2 }
  0xab   : > { %v200_v4 = vsub.f32 %v193_v0, %v199_v3 }
  0xad   : > { %v201_v5 = vmul.f32 %v200_v4, %v200_v4 }
  0xaf   : > { %v202_v6 = vsel %vm194_vm0, %v201_v5, 0.0 }
  0xb0   : > { %203 = vadd.xlane.f32.xlu0 %v202_v6 }
 0x13d   : > { %v204_v15 = vpop.xlane.xlu0 %203 }
 0x13e   : > { %v205_v16 = vmul.f32 0.03125, %v204_v15 }
 0x140   : > { %v206_v17 = vadd.f32 1e-07, %v205_v16 }
 0x142   : > { %678 = vrsqrt.f32 %v206_v17 }
 0x14c   : > { %v679_v20 = vpop.eup %678 }
 0x14d   : > { %v208_v22 = vmul.f32 %v679_v20, %v200_v4 }
 0x14f   : > { %580 = vmatmul.mubr.msk.f32.vlgmr.msra.gmra.mrb[0].mxu1 %vm194_vm0, %v208_v22 }
 0x150   : > { %620 = vmatpush3.bf16.msra.mxu1 %v619_v21  ;;  %590 = vmatprep.mubr.msk.f32.mxu1 %vm749_vm1, %v750_v13 }
 0x151   : > { %621 = vmatprep.subr.bf16.mxu1 %v748_v10 }
 0x154   : > { %623 = vmatpush3.bf16.msra.mxu1 %v622_v25 }
 0x157   : > { %591 = vmatmul.mubr.msk.f32.vlgmr.msra.gmra.mrb[2].mxu1 %vm194_vm0, %v208_v22 }
 0x222   : > { %v282_v26 = vpop.f32.mrb[0].mxu1 }
 0x223   : > { %v581_v27 = vpop.f32.mrb[1].mxu1 }
 0x22a   : > { %v356_v28 = vpop.f32.mrb[2].mxu1 }
 0x22b   : > { %v360_v29 = vmul.f32 %v356_v28, %v356_v28  ;;  %v592_v30 = vpop.f32.mrb[3].mxu1  ;;  %v365_v35 = vmul.f32 0.5, %v356_v28 }
 0x22d   : > { %v361_v31 = vmul.f32 0.035677407, %v360_v29 }
 0x22f   : > { %v362_v32 = vadd.f32 0.7978846, %v361_v31 }
 0x231   : > { %v363_v33 = vmul.f32 %v362_v32, %v356_v28 }
 0x233   : > { %680 = vtanh.f32 %v363_v33 }
 0x23d   : > { %v681_v34 = vpop.eup %680 }
 0x23e   : > { %v366_v36 = vadd.f32 1.0, %v681_v34 }
 0x240   : > { %v367_v37 = vmul.f32 %v366_v36, %v365_v35 }
 0x242   : > { %v368_v38 = vmul.f32 %v367_v37, %v282_v26 }
 0x244   : > { %v370_v39 = vsel %vm369_vm2, %v368_v38, 0.0 }
 0x245   : > { %371 = vadd.xlane.f32.xlu1 %v370_v39 }
 0x2d2   : > { %v372_v40 = vpop.xlane.xlu1 %371 }
 0x2d3   : > { %v374_v41 = vmul.f32 0.015625, %v372_v40 }
 0x2d5   : > { %v375_v42 = vsub.f32 %v368_v38, %v374_v41 }
 0x2d7   : > { %v376_v43 = vmul.f32 %v375_v42, %v375_v42 }
 0x2d9   : > { %v377_v44 = vsel %vm369_vm2, %v376_v43, 0.0 }
 0x2da   : > { %378 = vadd.xlane.f32.xlu1 %v377_v44 }
 0x367   : > { %v379_v57 = vpop.xlane.xlu1 %378 }
 0x368   : > { %v380_v58 = vmul.f32 0.015625, %v379_v57 }
 0x36a   : > { %v381_v59 = vadd.f32 1e-07, %v380_v58 }
 0x36c   : > { %682 = vrsqrt.f32 %v381_v59 }
 0x376   : > { %v683_v60 = vpop.eup %682 }
 0x377   : > { %v383_v61 = vmul.f32 %v683_v60, %v375_v42 }
 0x379   : > { %610 = vmatmul.mubr.msk.f32.vlgmr.msra.gmra.mrb[0].mxu0 %vm369_vm2, %v383_v61 }
 0x44c   : > { %v461_v62 = vpop.f32.mrb[0].mxu0 }
 0x44d   : > { %465 = vst.msk [vmem:[%s188_s7] sm:$0xff] %vm194_vm0, %v461_v62  ;;  %v611_v63 = vpop.f32.mrb[1].mxu0 }
 0x44e   : > { %697 = shalt.err (!%p694_p3)
}
 0x44f   : > { %s698_s22 = scalar_lea.hbm %s901_s11, 128  ;;  %s702_s28 = scalar_lea.hbm %s948_s4, 256 }
 0x450   : > { %p699_p4 = scmp.ne.s32.totalorder %s901_s11, %s698_s22  ;;  %p703_p9 = scmp.lt.u32.totalorder %s901_s11, %s948_s4 }
 0x451   : > { %p704_p10 = scmp.lt.u32.totalorder %s702_s28, %s698_s22  ;;  %p706_p12 = scmp.lt.u32.totalorder %s698_s22, %s901_s11 }
 0x452   : > { %p700_p7 = pnand %p699_p4, %p815_p5 }
 0x453   : > { %p705_p11 = por %p704_p10, %p703_p9 }
 0x454   : > { %p701_p8 = pneg %p700_p7 }
 0x455   : > { %p707_p13 = por %p706_p12, %p705_p11 }
 0x457   : > { %p708_p0 = pnand %p707_p13, %p701_p8 }
 0x459   : > { %711 = shalt.err (!%p708_p0)
}
 0x45a   : > { %636 = dma.vmem_to_hbm [thread:$0]  (%p815_p5), %s903_s8, 128, %s901_s11, %s467_s12  }
 0x45b PF: > { %p642_p1 = scmp.ge.s32.totalorder %s746_s18, 2  ;;  %s492_s5 = sand.u32 1, %s734_s15  }
 0x45c   : > { %s493_s6 = scalar_lea.sflag [#allocation3], %s492_s5 }
 0x45d   : > { %p639_p2 = pnand %p642_p1, %p819_p6 }
 0x45f   : > { %729 = dma.done.wait (!%p639_p2), %s493_s6, 128  }
 0x460   : > { %731 = vsyncadd (!%p639_p2), %s493_s6, 4294967168  ;;  %p14_p3 = scmp.ge.s32.totalorder %s802_s21, 4   ;;  %s951_s15 = smov %s738_s16 }
 0x461   : > { %s952_s16 = smov %s742_s17  ;;  %s953_s17 = smov %s813_s24 }
 0x462   : > { %s954_s18 = smov %s802_s21  ;;  %16 = sbr.rel (!%p14_p3) target bundleno = 3 (0x3), region = 71 }
 0x469   :  { %498 = vsyncpa [#allocation3], 1 }
 0x46a   :  { %500 = vsyncpa [#allocation3 + $0x1], 1 }

</bundles_post_ra>
